<compile_context>
chip_gen: v7x
topology: tpu7x:2x2x1
jax: 0.10.0
libtpu: 0.0.40
codegen_flags: <defaults>
</compile_context>

<pallas_src>
import jax
import jax.numpy as jnp
from jax.experimental import pallas as pl
from jax.experimental.pallas import tpu as pltpu


def conv1x1_kernel(w_ref, b_ref, x_ref, o_ref):
    # w_ref: (Cout, Cin), b_ref: (Cout, 1), x_ref: (1, Cin, HW), o_ref: (1, Cout, HW)
    acc = jnp.dot(w_ref[...], x_ref[0], preferred_element_type=jnp.float32)
    o_ref[0] = (acc + b_ref[...]).astype(o_ref.dtype)


def conv1x1(x_nchw, weight, bias):
    """x_nchw: (N, Cin, H, W); weight: (Cout, Cin, 1, 1); bias: (Cout,)."""
    N, Cin, H, W = x_nchw.shape
    Cout = weight.shape[0]
    HW = H * W

    # Free reshapes only -- no transposes.
    x3d = x_nchw.reshape(N, Cin, HW)        # (N, Cin, HW)
    w2d = weight.reshape(Cout, Cin)         # (Cout, Cin)
    b2d = bias.reshape(Cout, 1)             # broadcasts along the lane (HW) axis

    flops = 2 * N * HW * Cin * Cout
    bytes_accessed = 4 * (x3d.size + w2d.size + b2d.size + N * Cout * HW)

    out3d = pl.pallas_call(
        conv1x1_kernel,
        out_shape=jax.ShapeDtypeStruct((N, Cout, HW), x3d.dtype),
        grid=(N,),
        in_specs=[
            pl.BlockSpec((Cout, Cin), lambda n: (0, 0)),   # weight resident
            pl.BlockSpec((Cout, 1), lambda n: (0, 0)),     # bias resident
            pl.BlockSpec((1, Cin, HW), lambda n: (n, 0, 0)),
        ],
        out_specs=pl.BlockSpec((1, Cout, HW), lambda n: (n, 0, 0)),
        compiler_params=pltpu.CompilerParams(
            dimension_semantics=("parallel",)),
        cost_estimate=pl.CostEstimate(
            flops=flops, transcendentals=0, bytes_accessed=bytes_accessed),
    )(w2d, b2d, x3d)

    # Free reshape back to NCHW (channel axis already in place).
    return out3d.reshape(N, Cout, H, W)


if __name__ == "__main__":
    key = jax.random.PRNGKey(0)
    k_x, k_w, k_b = jax.random.split(key, 3)

    N, Cin, Cout, Hs, Ws = 2, 30, 20, 16, 16

    # Deterministic parameter init (mimics Conv2d's uniform fan-in scaling).
    bound = 1.0 / (Cin ** 0.5)
    weight = jax.random.uniform(k_w, (Cout, Cin, 1, 1), jnp.float32, -bound, bound)
    bias = jax.random.uniform(k_b, (Cout,), jnp.float32, -bound, bound)

    x = jax.random.normal(k_x, (N, Cin, Hs, Ws), jnp.float32)

    out = conv1x1(x, weight, bias)
    out = jax.block_until_ready(out)

    # Sanity check against a pure-JAX reference.
    ref = jnp.einsum("nchw,oc->nohw", x, weight.reshape(Cout, Cin)) \
        + bias[None, :, None, None]
    assert out.shape == (N, Cout, Hs, Ws)
    assert jnp.allclose(out, ref, atol=1e-4, rtol=1e-4)

    print("KERNEL_OK")
</pallas_src>

<mosaic_0001>
module attributes {stable_mosaic.version = 11 : i64} {
  func.func @conv1x1_kernel(%arg0: i32, %arg1: memref<20x30xf32, #tpu.memory_space<vmem>>, %arg2: memref<20x1xf32, #tpu.memory_space<vmem>>, %arg3: memref<1x30x256xf32, #tpu.memory_space<vmem>>, %arg4: memref<1x20x256xf32, #tpu.memory_space<vmem>>) attributes {dimension_semantics = [#tpu.dimension_semantics<parallel>], iteration_bounds = array<i64: 2>, scalar_prefetch = 0 : i64, scratch_operands = 0 : i64, tpu.core_type = #tpu.core_type<tc>, window_params = [{pipeline_mode = #tpu.pipeline_mode<synchronous>, transform_indices = @transform_0, window_bounds = array<i64: 20, 30>}, {pipeline_mode = #tpu.pipeline_mode<synchronous>, transform_indices = @transform_1, window_bounds = array<i64: 20, 1>}, {transform_indices = @transform_2, window_bounds = array<i64: 1, 30, 256>}, {transform_indices = @transform_3, window_bounds = array<i64: 1, 20, 256>}]} {
    %c0 = arith.constant 0 : index
    %c0_0 = arith.constant 0 : index
    %0 = vector.load %arg1[%c0, %c0_0] : memref<20x30xf32, #tpu.memory_space<vmem>>, vector<20x30xf32>
    %c0_1 = arith.constant 0 : index
    %c0_2 = arith.constant 0 : index
    %c0_3 = arith.constant 0 : index
    %1 = vector.load %arg3[%c0_1, %c0_2, %c0_3] : memref<1x30x256xf32, #tpu.memory_space<vmem>>, vector<1x30x256xf32>
    %2 = vector.shape_cast %1 : vector<1x30x256xf32> to vector<30x256xf32>
    %cst = arith.constant dense<0.000000e+00> : vector<20x256xf32>
    %3 = tpu.matmul %0, %2, %cst {dimension_numbers = #tpu.dot_dimension_numbers<[1], [0], [0], [1], [0, 0, 1, 1], [], []>} : vector<20x30xf32>, vector<30x256xf32>, vector<20x256xf32> -> vector<20x256xf32>
    %c0_4 = arith.constant 0 : index
    %c0_5 = arith.constant 0 : index
    %4 = vector.load %arg2[%c0_4, %c0_5] : memref<20x1xf32, #tpu.memory_space<vmem>>, vector<20x1xf32>
    %5 = vector.broadcast %4 : vector<20x1xf32> to vector<20x256xf32>
    %6 = arith.addf %3, %5 : vector<20x256xf32>
    %c0_6 = arith.constant 0 : index
    %c0_7 = arith.constant 0 : index
    %c0_8 = arith.constant 0 : index
    %7 = vector.load %arg4[%c0_6, %c0_7, %c0_8] : memref<1x20x256xf32, #tpu.memory_space<vmem>>, vector<1x20x256xf32>
    %8 = vector.shape_cast %7 : vector<1x20x256xf32> to vector<20x256xf32>
    %9 = vector.shape_cast %6 : vector<20x256xf32> to vector<1x20x256xf32>
    tpu.vector_store %arg4[%c0_6, %c0_7, %c0_8], %9 {strides = array<i32>} : memref<1x20x256xf32, #tpu.memory_space<vmem>>, vector<1x20x256xf32>,
    return
  }
  func.func @transform_0(%arg0: i32) -> (i32, i32) {
    %c0_i32 = arith.constant 0 : i32
    %c0_i32_0 = arith.constant 0 : i32
    %c0_i32_1 = arith.constant 0 : i32
    return %c0_i32, %c0_i32_0 : i32, i32
  }
  func.func @transform_1(%arg0: i32) -> (i32, i32) {
    %c0_i32 = arith.constant 0 : i32
    %c0_i32_0 = arith.constant 0 : i32
    %c0_i32_1 = arith.constant 0 : i32
    return %c0_i32, %c0_i32_0 : i32, i32
  }
  func.func @transform_2(%arg0: i32) -> (i32, i32, i32) {
    %c0_i32 = arith.constant 0 : i32
    %c0_i32_0 = arith.constant 0 : i32
    %c0_i32_1 = arith.constant 0 : i32
    return %arg0, %c0_i32, %c0_i32_0 : i32, i32, i32
  }
  func.func @transform_3(%arg0: i32) -> (i32, i32, i32) {
    %c0_i32 = arith.constant 0 : i32
    %c0_i32_0 = arith.constant 0 : i32
    %c0_i32_1 = arith.constant 0 : i32
    return %arg0, %c0_i32, %c0_i32_0 : i32, i32, i32
  }
}

</mosaic_0001>

<bundles_post_ra>
// kernel: tpu_custom_call.1
= control target key start
LH: loop header
LB: loop body
LE: loop exit
PB: predicated region body
PF: predicated region fallthrough
CT: control target
= control target key end

     0   :  { %s436_s12 = smov 0   ;;  %s475_s0 = inlined_call_operand.vmem [shape: f32[20,30], index: 0, kind: input, shape index: {}]   ;;  %s476_s1 = inlined_call_operand.vmem [shape: f32[20,1], index: 1, kind: input, shape index: {}]   ;;  %s477_s2 = inlined_call_operand.vmem [shape: f32[2,30,256], index: 2, kind: input, shape index: {}]   ;;  %s478_s3 = inlined_call_operand.vmem [shape: f32[2,20,256], index: 3, kind: output, shape index: {}]  }
   0x1 LB: > { %s361_s13 = sadd.s32 4294967295, %s411_s12   ;;  %p365_p0 = scmp.ge.s32.totalorder %s411_s12, 1  ;;  %s411_s12 = sphi %s436_s12, %s13_s12  }
   0x2   : > { %p137_p1 = scmp.lt.s32.totalorder %s411_s12, 3 }
   0x4   : > { %p138_p2 = pnand %p365_p0, %p137_p1 }
   0x5   : > { %p161_p3 = scmp.lt.s32.totalorder (!%p138_p2), %s361_s13, 1  ;;  %v413_v0 = vmov (!%p138_p2), 0.0   ;;  %v414_v1 = vmov (!%p138_p2), 0   ;;  %v182_v2 = vld [vmem:[%s476_s1] sm:$0xff] (!%p138_p2)  ;;  %v184_v3 = vld [vmem:[%s476_s1 + $0x10] sm:$0xf] (!%p138_p2) }
   0x6   : > { %141 = sbr.rel (%p138_p2) target bundleno = 247 (0xf7), region = 32  ;;  %281 = vmatprep.mubr.f32.mxu0 (!%p138_p2), %v413_v0  ;;  %287 = vmatprep.mubr.f32.mxu1 (!%p138_p2), %v413_v0  ;;  %v183_v4 = vld [vmem:[%s476_s1 + $0x8] sm:$0xff] (!%p138_p2)  ;;  %vm210_vm0 = vcmask (!%p138_p2), 1045504   ;;  %vm415_vm1 = vmmov (!%p138_p2), 1   ;;  %v171_v17 = vld [vmem:[%s475_s0] sm:$0xff] (!%p138_p2)  ;;  %vm200_vm3 = vcmask (!%p138_p2), 244736  }
   0x7   : > { %403 = vset.pattern.permute.xlu0 (!%p138_p2), %v414_v1  ;;  %404 = vset.pattern.permute.xlu1 (!%p138_p2), %v414_v1  ;;  %vm382_vm2 = vmpackc.low (!%p138_p2), %vm210_vm0, %vm415_vm1  ;;  %v172_v18 = vld [vmem:[%s475_s0 + $0x8] sm:$0xff] (!%p138_p2)  ;;  %v173_v19 = vld [vmem:[%s475_s0 + $0x10] sm:$0xf] (!%p138_p2) }
   0x8   : > { %187 = vperm.xlu0 (!%p138_p2), %403, %v182_v2   ;;  %197 = vperm.xlu1 (!%p138_p2), %404, %v184_v3  }
   0xc   : > { %192 = vperm.xlu0 (!%p138_p2), %403, %v183_v4  }
   0xd   : > { %s480_s13 = smov (!%p161_p3, %s361_s13), 1 }
   0xe   : > { %s376_s18 = sshll.u32 %s480_s13, 6  ;;  %s391_s30 = smul.u32 48, %s480_s13 }
   0xf   : > { %s165_s23 = scalar_lea.vmem %s477_s2, %s376_s18 }
  0x10   : > { %v175_v5 = vld [vmem:[%s165_s23 + $0x8] sm:$0xff]  ;;  %v177_v6 = vld [vmem:[%s165_s23 + $0x18] sm:$0xff]  ;;  %v174_v7 = vld [vmem:[%s165_s23] sm:$0xff]  ;;  %s170_s6 = scalar_lea.vmem %s478_s3, %s391_s30 }
  0x11   : > { %v377_v8 = vpack.c.bf16 %v177_v6, %v175_v5  ;;  %v176_v9 = vld [vmem:[%s165_s23 + $0x10] sm:$0xff]  ;;  %v179_v10 = vld [vmem:[%s165_s23 + $0x28] sm:$0xff]  ;;  %v181_v11 = vld [vmem:[%s165_s23 + $0x38] sm:$0x3f] }
  0x12   : > { %v379_v12 = vpack.c.bf16 %v176_v9, %v174_v7  ;;  %v381_v13 = vpack.c.bf16 %v181_v11, %v179_v10  ;;  %v178_v14 = vld [vmem:[%s165_s23 + $0x20] sm:$0xff]  ;;  %v180_v15 = vld [vmem:[%s165_s23 + $0x30] sm:$0x3f] }
  0x13   : > { %378 = vmatprep.subr.bf16.mxu0 %v377_v8  ;;  %387 = vmatprep.subr.bf16.mxu1 %v377_v8  ;;  %v384_v16 = vpack.c.bf16 %v180_v15, %v178_v14 }
  0x14   : > { %380 = vmatpush1.bf16.msra.mxu0 %v379_v12  ;;  %389 = vmatpush1.bf16.msra.mxu1 %v379_v12 }
  0x15   : > { %383 = vmatprep.subr.msk.bf16.mxu0 %vm382_vm2, %v381_v13  ;;  %388 = vmatprep.subr.msk.bf16.mxu1 %vm382_vm2, %v381_v13 }
  0x18   : > { %386 = vmatpush1.bf16.msk.msra.mxu0 %vm382_vm2, %v384_v16  ;;  %390 = vmatpush1.bf16.msk.msra.mxu1 %vm382_vm2, %v384_v16 }
  0x1b   : > { %371 = vmatmul.mubr.msk.f32.vlgmr.msra.gmra.mrb[0].mxu0 %vm200_vm3, %v171_v17  ;;  %372 = vmatmul.mubr.msk.f32.vlgmr.msra.gmra.mrb[0].mxu1 %vm200_vm3, %v172_v18 }
  0x1c   : > { %293 = vmatprep.mubr.f32.mxu1 %v413_v0 }
  0x1f   : > { %373 = vmatmul.mubr.msk.f32.gmra.mrb[2].mxu1 %vm200_vm3, %v173_v19 }
  0x87   : > { %v188_v20 = vpop.permute.xlu0 %187  ;;  %v198_v30 = vpop.permute.xlu1 %197 }
  0x8b   : > { %v193_v21 = vpop.permute.xlu0 %192 }
  0xee   : > { %v283_v22 = vpop.f32.mrb[0].mxu0  ;;  %v289_v23 = vpop.f32.mrb[0].mxu1 }
  0xef   : > { %v284_v24 = vadd.f32 %v283_v22, %v188_v20  ;;  %v290_v25 = vadd.f32 %v289_v23, %v193_v21  ;;  %v285_v26 = vpop.f32.mrb[1].mxu0  ;;  %v291_v27 = vpop.f32.mrb[1].mxu1 }
  0xf0   : > { %v286_v28 = vadd.f32 %v285_v26, %v188_v20  ;;  %v292_v29 = vadd.f32 %v291_v27, %v193_v21 }
  0xf1   : > { %300 = vst [vmem:[%s170_s6] sm:$0xff] %v284_v24  ;;  %302 = vst [vmem:[%s170_s6 + $0x10] sm:$0xff] %v290_v25 }
  0xf2   : > { %301 = vst [vmem:[%s170_s6 + $0x8] sm:$0xff] %v286_v28  ;;  %303 = vst [vmem:[%s170_s6 + $0x18] sm:$0xff] %v292_v29  ;;  %v295_v31 = vpop.f32.mrb[2].mxu1 }
  0xf3   : > { %v296_v32 = vadd.f32 %v295_v31, %v198_v30  ;;  %v297_v33 = vpop.f32.mrb[3].mxu1 }
  0xf4   : > { %v298_v34 = vadd.f32 %v297_v33, %v198_v30 }
  0xf5   : > { %304 = vst [vmem:[%s170_s6 + $0x20] sm:$0xf] %v296_v32 }
  0xf6   : > { %305 = vst [vmem:[%s170_s6 + $0x28] sm:$0xf] %v298_v34 }
  0xf7 PF: > { %s13_s12 = sadd.s32 1, %s411_s12  }
  0xf8   : > { %p10_p4 = scmp.ge.s32.totalorder %s13_s12, 4  }
  0xfa   :  { %12 = sbr.rel (!%p10_p4) target bundleno = 1 (0x1), region = 62 }

</bundles_post_ra>
